<compile_context>
chip_gen: v7x
topology: tpu7x:2x2x1
jax: 0.10.0
libtpu: 0.0.40
codegen_flags: <defaults>
</compile_context>

<pallas_src>
import jax
import jax.numpy as jnp
from jax.experimental import pallas as pl
from jax.experimental.pallas import tpu as pltpu

_LANES = 128
_SUBLANES = 8
_TILE_ROWS_MAX = 8192  # 8192 x 128 x 4B = 4 MiB per f32 input block


def _make_dice_kernel(tile_rows, rows, n_half, n_blocks, needs_mask):
    def dice_kernel(x_ref, y_ref, inter_ref, union_ref):
        c = pl.program_id(0)   # core-parallel half (v7x: one per TensorCore)
        i = pl.program_id(1)   # sequential reduction steps within the half

        @pl.when(i == 0)
        def _():
            inter_ref[...] = jnp.zeros_like(inter_ref)
            union_ref[...] = jnp.zeros_like(union_ref)

        # Upcast in-kernel (no-op for f32 inputs; keeps bf16 storage cheap in HBM).
        x = x_ref[...].astype(jnp.float32)
        y = y_ref[...].astype(jnp.float32)

        if needs_mask:
            # Un-clamped linear block id; rows past `rows` (tail padding or a
            # duplicated clamped block) are zeroed, which is exact for the sums.
            blk = c * n_half + i
            row0 = blk * tile_rows
            row_ids = row0 + jax.lax.broadcasted_iota(
                jnp.int32, (tile_rows, _LANES), 0)
            valid = row_ids < rows
            x = jnp.where(valid, x, 0.0)
            y = jnp.where(valid, y, 0.0)

        # VPU-only partial reduction down to one (8,128) vreg per quantity.
        n_groups = tile_rows // _SUBLANES
        inter = (x * y).reshape(n_groups, _SUBLANES, _LANES).sum(axis=0)
        union = (x * x + y * y).reshape(n_groups, _SUBLANES, _LANES).sum(axis=0)

        inter_ref[...] += inter
        union_ref[...] += union

    return dice_kernel


def dice_loss(x, y, offset: float = 1.0, eps: float = 1e-6):
    """offset - dice_coefficient(x, y); heavy reductions run inside the kernel."""
    xf = jnp.ravel(x)
    yf = jnp.ravel(y)
    n = xf.shape[0]

    # Only pad (by < 1024 elems) if the flat length is not a multiple of 8*128;
    # common NN shapes (incl. the test) skip this copy entirely.
    chunk = _SUBLANES * _LANES
    padded = ((n + chunk - 1) // chunk) * chunk
    if padded != n:
        xf = jnp.pad(xf, (0, padded - n))
        yf = jnp.pad(yf, (0, padded - n))
    rows = padded // _LANES                       # multiple of 8
    x2 = xf.reshape(rows, _LANES)
    y2 = yf.reshape(rows, _LANES)

    tile_rows = min(_TILE_ROWS_MAX, rows)         # multiple of 8 by construction
    n_blocks = pl.cdiv(rows, tile_rows)
    n_half = pl.cdiv(n_blocks, 2)
    needs_mask = (rows % tile_rows != 0) or (n_blocks % 2 != 0)

    def in_map(c, i):
        # Clamp so the DMA never starts past the array; out-of-range work is
        # masked to zero inside the kernel.
        return (jnp.minimum(c * n_half + i, n_blocks - 1), 0)

    def out_map(c, i):
        return (c, 0, 0)

    acc_shape = jax.ShapeDtypeStruct((2, _SUBLANES, _LANES), jnp.float32)

    inter_p, union_p = pl.pallas_call(
        _make_dice_kernel(tile_rows, rows, n_half, n_blocks, needs_mask),
        out_shape=(acc_shape, acc_shape),
        grid_spec=pltpu.PrefetchScalarGridSpec(
            num_scalar_prefetch=0,
            grid=(2, n_half),
            in_specs=[
                pl.BlockSpec((tile_rows, _LANES), in_map),
                pl.BlockSpec((tile_rows, _LANES), in_map),
            ],
            out_specs=[
                pl.BlockSpec((None, _SUBLANES, _LANES), out_map),
                pl.BlockSpec((None, _SUBLANES, _LANES), out_map),
            ],
        ),
        compiler_params=pltpu.CompilerParams(
            dimension_semantics=("parallel", "arbitrary"),
            vmem_limit_bytes=48 * 1024 * 1024,
        ),
    )(x2, y2)

    # Tiny epilogue on (2,8,128) partials: final cross-lane reduce + divide.
    intersection = jnp.sum(inter_p)
    union = jnp.sum(union_p)
    return jnp.float32(offset) - 2.0 * intersection / jnp.maximum(
        union, jnp.float32(eps))


def dice_loss_ref(x, y, offset=1.0, eps=1e-6):
    xf = x.astype(jnp.float32)
    yf = y.astype(jnp.float32)
    intersection = jnp.sum(xf * yf)
    union = jnp.sum(xf * xf) + jnp.sum(yf * yf)
    return offset - 2.0 * intersection / jnp.maximum(union, eps)


if __name__ == "__main__":
    key = jax.random.PRNGKey(0)
    kx, ky = jax.random.split(key)
    # prediction and target, NCHW-like shape [2, 4, 16, 16]
    x = jax.random.uniform(kx, (2, 4, 16, 16), dtype=jnp.float32)
    y = (jax.random.uniform(ky, (2, 4, 16, 16), dtype=jnp.float32) > 0.5).astype(
        jnp.float32
    )

    out = jax.block_until_ready(dice_loss(x, y, offset=1.0))
    ref = dice_loss_ref(x, y, offset=1.0)
    assert jnp.allclose(out, ref, atol=1e-5, rtol=1e-5), (out, ref)
    print("KERNEL_OK")
</pallas_src>

<mosaic_0001>
module attributes {stable_mosaic.version = 11 : i64} {
  func.func @dice_kernel(%arg0: i32, %arg1: i32, %arg2: memref<16x128xf32, #tpu.memory_space<vmem>>, %arg3: memref<16x128xf32, #tpu.memory_space<vmem>>, %arg4: memref<1x8x128xf32, #tpu.memory_space<vmem>>, %arg5: memref<1x8x128xf32, #tpu.memory_space<vmem>>) attributes {dimension_semantics = [#tpu.dimension_semantics<parallel>, #tpu.dimension_semantics<arbitrary>], iteration_bounds = array<i64: 2, 1>, scalar_prefetch = 0 : i64, scratch_operands = 0 : i64, tpu.core_type = #tpu.core_type<tc>, window_params = [{transform_indices = @transform_0, window_bounds = array<i64: 16, 128>}, {transform_indices = @transform_1, window_bounds = array<i64: 16, 128>}, {transform_indices = @transform_2, window_bounds = array<i64: 1, 8, 128>}, {transform_indices = @transform_3, window_bounds = array<i64: 1, 8, 128>}]} {
    %c0_i32 = arith.constant 0 : i32
    %0 = arith.cmpi eq, %arg1, %c0_i32 : i32
    %1 = arith.extui %0 : i1 to i32
    %c0_i32_0 = arith.constant 0 : i32
    %2 = arith.cmpi ne, %1, %c0_i32_0 : i32
    scf.if %2 {
      %cst_20 = arith.constant 0.000000e+00 : f32
      %37 = vector.broadcast %cst_20 : f32 to vector<8x128xf32>
      %c0_21 = arith.constant 0 : index
      %c0_22 = arith.constant 0 : index
      %c0_23 = arith.constant 0 : index
      %38 = vector.load %arg4[%c0_21, %c0_22, %c0_23] : memref<1x8x128xf32, #tpu.memory_space<vmem>>, vector<1x8x128xf32>
      %39 = vector.shape_cast %38 : vector<1x8x128xf32> to vector<8x128xf32>
      %40 = vector.shape_cast %37 : vector<8x128xf32> to vector<1x8x128xf32>
      tpu.vector_store %arg4[%c0_21, %c0_22, %c0_23], %40 {strides = array<i32>} : memref<1x8x128xf32, #tpu.memory_space<vmem>>, vector<1x8x128xf32>,
      %cst_24 = arith.constant 0.000000e+00 : f32
      %41 = vector.broadcast %cst_24 : f32 to vector<8x128xf32>
      %c0_25 = arith.constant 0 : index
      %c0_26 = arith.constant 0 : index
      %c0_27 = arith.constant 0 : index
      %42 = vector.load %arg5[%c0_25, %c0_26, %c0_27] : memref<1x8x128xf32, #tpu.memory_space<vmem>>, vector<1x8x128xf32>
      %43 = vector.shape_cast %42 : vector<1x8x128xf32> to vector<8x128xf32>
      %44 = vector.shape_cast %41 : vector<8x128xf32> to vector<1x8x128xf32>
      tpu.vector_store %arg5[%c0_25, %c0_26, %c0_27], %44 {strides = array<i32>} : memref<1x8x128xf32, #tpu.memory_space<vmem>>, vector<1x8x128xf32>,
    } else {
    }
    %c0 = arith.constant 0 : index
    %c0_1 = arith.constant 0 : index
    %3 = vector.load %arg2[%c0, %c0_1] : memref<16x128xf32, #tpu.memory_space<vmem>>, vector<16x128xf32>
    %c0_2 = arith.constant 0 : index
    %c0_3 = arith.constant 0 : index
    %4 = vector.load %arg3[%c0_2, %c0_3] : memref<16x128xf32, #tpu.memory_space<vmem>>, vector<16x128xf32>
    %c1_i32 = arith.constant 1 : i32
    %5 = arith.muli %arg0, %c1_i32 : i32
    %6 = arith.addi %5, %arg1 : i32
    %c16_i32 = arith.constant 16 : i32
    %7 = arith.muli %6, %c16_i32 : i32
    %8 = tpu.iota {dimensions = array<i32: 0>} : vector<16x128xi32>
    %9 = vector.broadcast %7 : i32 to vector<16x128xi32>
    %10 = arith.addi %9, %8 : vector<16x128xi32>
    %c16_i32_4 = arith.constant 16 : i32
    %11 = vector.broadcast %c16_i32_4 : i32 to vector<16x128xi32>
    %12 = arith.cmpi slt, %10, %11 : vector<16x128xi32>
    %cst = arith.constant 0.000000e+00 : f32
    %13 = vector.broadcast %cst : f32 to vector<16x128xf32>
    %14 = arith.select %12, %3, %13 : vector<16x128xi1>, vector<16x128xf32>
    %cst_5 = arith.constant 0.000000e+00 : f32
    %15 = vector.broadcast %cst_5 : f32 to vector<16x128xf32>
    %16 = arith.select %12, %4, %15 : vector<16x128xi1>, vector<16x128xf32>
    %17 = arith.mulf %14, %16 : vector<16x128xf32>
    %18 = vector.shape_cast %17 : vector<16x128xf32> to vector<2x8x128xf32>
    %cst_6 = arith.constant dense<0.000000e+00> : vector<8x128xf32>
    %19 = vector.multi_reduction <add>, %18, %cst_6 [0] : vector<2x8x128xf32> to vector<8x128xf32>
    %20 = arith.mulf %14, %14 : vector<16x128xf32>
    %21 = arith.mulf %16, %16 : vector<16x128xf32>
    %22 = arith.addf %20, %21 : vector<16x128xf32>
    %23 = vector.shape_cast %22 : vector<16x128xf32> to vector<2x8x128xf32>
    %cst_7 = arith.constant dense<0.000000e+00> : vector<8x128xf32>
    %24 = vector.multi_reduction <add>, %23, %cst_7 [0] : vector<2x8x128xf32> to vector<8x128xf32>
    %c0_8 = arith.constant 0 : index
    %c0_9 = arith.constant 0 : index
    %c0_10 = arith.constant 0 : index
    %25 = vector.load %arg4[%c0_8, %c0_9, %c0_10] : memref<1x8x128xf32, #tpu.memory_space<vmem>>, vector<1x8x128xf32>
    %26 = vector.shape_cast %25 : vector<1x8x128xf32> to vector<8x128xf32>
    %27 = arith.addf %26, %19 : vector<8x128xf32>
    %c0_11 = arith.constant 0 : index
    %c0_12 = arith.constant 0 : index
    %c0_13 = arith.constant 0 : index
    %28 = vector.load %arg4[%c0_11, %c0_12, %c0_13] : memref<1x8x128xf32, #tpu.memory_space<vmem>>, vector<1x8x128xf32>
    %29 = vector.shape_cast %28 : vector<1x8x128xf32> to vector<8x128xf32>
    %30 = vector.shape_cast %27 : vector<8x128xf32> to vector<1x8x128xf32>
    tpu.vector_store %arg4[%c0_11, %c0_12, %c0_13], %30 {strides = array<i32>} : memref<1x8x128xf32, #tpu.memory_space<vmem>>, vector<1x8x128xf32>,
    %c0_14 = arith.constant 0 : index
    %c0_15 = arith.constant 0 : index
    %c0_16 = arith.constant 0 : index
    %31 = vector.load %arg5[%c0_14, %c0_15, %c0_16] : memref<1x8x128xf32, #tpu.memory_space<vmem>>, vector<1x8x128xf32>
    %32 = vector.shape_cast %31 : vector<1x8x128xf32> to vector<8x128xf32>
    %33 = arith.addf %32, %24 : vector<8x128xf32>
    %c0_17 = arith.constant 0 : index
    %c0_18 = arith.constant 0 : index
    %c0_19 = arith.constant 0 : index
    %34 = vector.load %arg5[%c0_17, %c0_18, %c0_19] : memref<1x8x128xf32, #tpu.memory_space<vmem>>, vector<1x8x128xf32>
    %35 = vector.shape_cast %34 : vector<1x8x128xf32> to vector<8x128xf32>
    %36 = vector.shape_cast %33 : vector<8x128xf32> to vector<1x8x128xf32>
    tpu.vector_store %arg5[%c0_17, %c0_18, %c0_19], %36 {strides = array<i32>} : memref<1x8x128xf32, #tpu.memory_space<vmem>>, vector<1x8x128xf32>,
    return
  }
  func.func @transform_0(%arg0: i32, %arg1: i32) -> (i32, i32) {
    %c1_i32 = arith.constant 1 : i32
    %0 = arith.muli %arg0, %c1_i32 : i32
    %1 = arith.addi %0, %arg1 : i32
    %c0_i32 = arith.constant 0 : i32
    %2 = arith.minsi %1, %c0_i32 : i32
    %c0_i32_0 = arith.constant 0 : i32
    %c0_i32_1 = arith.constant 0 : i32
    return %2, %c0_i32_0 : i32, i32
  }
  func.func @transform_1(%arg0: i32, %arg1: i32) -> (i32, i32) {
    %c1_i32 = arith.constant 1 : i32
    %0 = arith.muli %arg0, %c1_i32 : i32
    %1 = arith.addi %0, %arg1 : i32
    %c0_i32 = arith.constant 0 : i32
    %2 = arith.minsi %1, %c0_i32 : i32
    %c0_i32_0 = arith.constant 0 : i32
    %c0_i32_1 = arith.constant 0 : i32
    return %2, %c0_i32_0 : i32, i32
  }
  func.func @transform_2(%arg0: i32, %arg1: i32) -> (i32, i32, i32) {
    %c0_i32 = arith.constant 0 : i32
    %c0_i32_0 = arith.constant 0 : i32
    %c0_i32_1 = arith.constant 0 : i32
    return %arg0, %c0_i32, %c0_i32_0 : i32, i32, i32
  }
  func.func @transform_3(%arg0: i32, %arg1: i32) -> (i32, i32, i32) {
    %c0_i32 = arith.constant 0 : i32
    %c0_i32_0 = arith.constant 0 : i32
    %c0_i32_1 = arith.constant 0 : i32
    return %arg0, %c0_i32, %c0_i32_0 : i32, i32, i32
  }
}

</mosaic_0001>

<bundles_post_ra>
// kernel: tpu_custom_call.1
= control target key start
LH: loop header
LB: loop body
LE: loop exit
PB: predicated region body
PF: predicated region fallthrough
CT: control target
= control target key end

     0   :  { %9 = vsyncpa [#allocation3], 0  ;;  %s1074_s0 = inlined_call_operand.hbm [shape: f32[16,128], index: 0, kind: input, shape index: {}]   ;;  %s1075_s1 = inlined_call_operand.hbm [shape: f32[16,128], index: 1, kind: input, shape index: {}]   ;;  %s1076_s2 = inlined_call_operand.hbm [shape: f32[2,8,128], index: 2, kind: output, shape index: {0}]   ;;  %s1077_s3 = inlined_call_operand.hbm [shape: f32[2,8,128], index: 3, kind: output, shape index: {1}]  }
   0x1   :  { %11 = vsyncpa [#allocation3 + $0x1], 0 }
   0x2   :  { %12 = vsyncpa [#allocation6], 0 }
   0x3   :  { %14 = vsyncpa [#allocation6 + $0x1], 0 }
   0x4   :  { %15 = vsyncpa [#allocation4], 0 }
   0x5   :  { %17 = vsyncpa [#allocation4 + $0x1], 0 }
   0x6   :  { %18 = vsyncpa [#allocation9], 0 }
   0x7   :  { %20 = vsyncpa [#allocation9 + $0x1], 0  ;;  %s833_s12 = smov 0   ;;  %s835_s13 = smov 0  }
   0x8   :  { %s837_s14 = smov 0   ;;  %s839_s15 = smov 0  }
   0x9   :  { %s841_s16 = smov 0   ;;  %s843_s17 = smov 0  }
   0xa   :  { %s845_s18 = smov 0   ;;  %s847_s19 = smov 0  }
   0xb LB: > { %s483_s20 = sadd.s32 4294967295, %s805_s19   ;;  %s484_s21 = sadd.s32 4294967294, %s805_s19   ;;  %s805_s19 = sphi %s847_s19, %s26_s19   ;;  %s801_s18 = sphi %s845_s18, %s1096_s18   ;;  %s797_s17 = sphi %s843_s17, %s1095_s17   ;;  %s793_s16 = sphi %s841_s16, %s1064_s16   ;;  %s789_s15 = sphi %s839_s15, %s1094_s15   ;;  %s785_s14 = sphi %s837_s14, %s1093_s14   ;;  %s781_s13 = sphi %s835_s13, %s1092_s13   ;;  %s777_s12 = sphi %s833_s12, %s1091_s12  }
   0xc   : > { %s38_s22 = sadd.s32 1, %s801_s18  ;;  %p774_p1 = scmp.ne.s32.totalorder %s793_s16, 0 }
   0xd   : > { %p40_p0 = scmp.ge.s32.totalorder %s38_s22, 2  ;;  %p59_p2 = scmp.eq.s32.totalorder %s805_s19, 0 }
   0xe   : > { %p64_p3 = scmp.ne.s32.totalorder %s793_s16, %s789_s15  ;;  %p65_p5 = scmp.eq.s32.totalorder %s483_s20, 0 }
   0xf   : > { %s1098_s22 = smov (%p40_p0, %s38_s22), 0  ;;  %p879_p4 = por %p774_p1, %p59_p2 }
  0x10   : > { %p883_p6 = por %p65_p5, %p64_p3  ;;  %s106_s25 = ssub.s32 %s801_s18, %s1098_s22 }
  0x11   : > { %p107_p7 = scmp.eq.s32.totalorder %s106_s25, 0  ;;  %s109_s26 = sadd.s32 1, %s785_s14 }
  0x12   : > { %s1081_s24 = scalar_select %p883_p6, 1, 0 }
  0x13   : > { %s891_s27 = scalar_select %p107_p7, %s785_s14, %s109_s26  }
  0x14   : > { %p119_p8 = scmp.ne.s32.totalorder %s785_s14, %s781_s13  ;;  %p120_p9 = scmp.eq.s32.totalorder %s483_s20, 1 }
  0x15   : > { %p125_p10 = scmp.ne.s32.totalorder %s781_s13, %s777_s12  ;;  %p126_p11 = scmp.eq.s32.totalorder %s484_s21, 1 }
  0x16   : > { %p897_p12 = por %p120_p9, %p119_p8  ;;  %p529_p1 = scmp.lt.s32.totalorder %s805_s19, 2 }
  0x17   : > { %p902_p0 = por %p126_p11, %p125_p10  ;;  %s807_s30 = smov [#allocation2]  }
  0x18   : > { %s1082_s28 = scalar_select %p897_p12, 1, 0 }
  0x19   : > { %s1083_s29 = scalar_select %p902_p0, 1, 0 }
  0x1a   : > { %s186_s4 = sshll.u32 %s807_s30, 4  ;;  %p909_p2 = pnand %p529_p1, %p879_p4  ;;  %s187_s4 = int_to_ptr.vmem [resolvable:$true] %s186_s4 }
  0x1b   : > { %s606_s8 = scalar_lea.hbm %s1074_s0, 256 }
  0x1c   : > { %p607_p3 = scmp.ne.s32.totalorder %s1074_s0, %s606_s8  ;;  %p608_p5 = pneg %p909_p2 }
  0x1d   : > { %p613_p8 = scmp.lt.u32.totalorder %s606_s8, %s606_s8  ;;  %p615_p9 = scmp.lt.u32.totalorder %s606_s8, %s1074_s0 }
  0x1e   : > { %p609_p7 = pnand %p608_p5, %p607_p3 }
  0x1f   : > { %p616_p10 = por %p615_p9, %p613_p8 }
  0x20   : > { %p610_p4 = pneg %p609_p7 }
  0x22   : > { %p617_p11 = pnand %p616_p10, %p610_p4 }
  0x24   : > { %620 = shalt.err (!%p617_p11)
}
  0x25   : > { %s621_s20 = scalar_lea.vmem %s187_s4, 256  ;;  %s628_s21 = scalar_lea.vmem %s187_s4, 512 }
  0x26   : > { %p622_p1 = scmp.ne.s32.totalorder %s187_s4, %s621_s20  ;;  %p629_p12 = scmp.lt.s32.totalorder %s187_s4, %s187_s4 }
  0x27   : > { %p630_p6 = scmp.lt.s32.totalorder %s628_s21, %s621_s20 }
  0x28   : > { %p624_p13 = pnand %p622_p1, %p608_p5 }
  0x29   : > { %p631_p3 = por %p630_p6, %p629_p12 }
  0x2a   : > { %p625_p0 = pneg %p624_p13 }
  0x2c   : > { %p632_p7 = pnand %p631_p3, %p625_p0 }
  0x2e   : > { %635 = shalt.err (!%p632_p7)
}
  0x2f   : > { %s808_s23 = smov 128   ;;  %s809_s25 = smov 8  }
  0x30   : > { %518 = dma.hbm_to_vmem [thread:$0]  (!%p909_p2), %s1074_s0, 256, %s187_s4, [#allocation3], %s808_s23, %s808_s23, %s809_s25  }
  0x31   : > { %p493_p13 = scmp.ge.s32.totalorder %s805_s19, 1  ;;  %p218_p4 = scmp.lt.s32.totalorder %s805_s19, 3 }
  0x32   : > { %s810_s7 = smov [#allocation5]   ;;  %s636_s11 = scalar_lea.hbm %s1075_s1, 256 }
  0x33   : > { %p940_p8 = pnand %p493_p13, %p218_p4  ;;  %s210_s8 = sshll.u32 %s810_s7, 4  ;;  %s211_s8 = int_to_ptr.vmem [resolvable:$true] %s210_s8 }
  0x34   : > { %p637_p6 = scmp.ne.s32.totalorder %s1075_s1, %s636_s11  ;;  %p643_p9 = scmp.lt.u32.totalorder %s636_s11, %s636_s11 }
  0x35   : > { %s1085_s6 = scalar_select %p940_p8, 1, 0 }
  0x36   : > { %p639_p12 = pnand %p637_p6, %p608_p5  ;;  %p645_p10 = scmp.lt.u32.totalorder %s636_s11, %s1075_s1 }
  0x38   : > { %p640_p0 = pneg %p639_p12  ;;  %p646_p11 = por %p645_p10, %p643_p9 }
  0x3a   : > { %p647_p1 = pnand %p646_p11, %p640_p0 }
  0x3c   : > { %650 = shalt.err (!%p647_p1)
}
  0x3d   : > { %s651_s26 = scalar_lea.vmem %s211_s8, 256  ;;  %s658_s30 = scalar_lea.vmem %s211_s8, 512 }
  0x3e   : > { %p652_p3 = scmp.ne.s32.totalorder %s211_s8, %s651_s26  ;;  %p659_p4 = scmp.lt.s32.totalorder %s211_s8, %s211_s8 }
  0x3f   : > { %p660_p8 = scmp.lt.s32.totalorder %s658_s30, %s651_s26 }
  0x40   : > { %p654_p7 = pnand %p652_p3, %p608_p5 }
  0x41   : > { %p661_p6 = por %p660_p8, %p659_p4 }
  0x42   : > { %p655_p13 = pneg %p654_p7 }
  0x44   : > { %p662_p12 = pnand %p661_p6, %p655_p13 }
  0x46   : > { %665 = shalt.err (!%p662_p12)
}
  0x47   : > { %521 = dma.hbm_to_vmem [thread:$0]  (!%p909_p2), %s1075_s1, 256, %s211_s8, [#allocation6], %s808_s23, %s808_s23, %s809_s25  }
  0x48   : > { %p1086_p0 = scmp.ne.s32.totalorder %s1085_s6, 0 }
  0x49   : > { %s224_s10 = sand.u32 (!%p1086_p0), 1, %s793_s16   ;;  %p1087_p5 = scmp.ne.s32.totalorder (!%p1086_p0), %s1081_s24, 0 }
  0x4a   : > { %222 = sbr.rel (%p1086_p0) target bundleno = 136 (0x88), region = 28  ;;  %s494_s11 = sshll.u32 (!%p1086_p0), %s224_s10, 4 }
  0x4b   : > { %s225_s15 = scalar_lea.sflag (!%p1086_p0), [#allocation3], %s224_s10  ;;  %s228_s20 = scalar_lea.vmem (!%p1086_p0), [#allocation2], %s494_s11 }
  0x51   : > { %759 = dma.done.wait (%p1087_p5), %s225_s15, 256  }
  0x52   : > { %761 = vsyncadd (%p1087_p5), %s225_s15, 4294967040  ;;  %s234_s5 = scalar_lea.sflag [#allocation6], %s224_s10  ;;  %s237_s4 = scalar_lea.vmem [#allocation5], %s494_s11 }
  0x53   : > { %763 = dma.done.wait (%p1087_p5), %s234_s5, 256  }
  0x54   : > { %765 = vsyncadd (%p1087_p5), %s234_s5, 4294967040  ;;  %s498_s23 = sshll.u32 %s797_s17, 4  ;;  %v290_v0 = vlaneseq  ;;  %s980_s25 = sand.u32 1, %s781_s13   ;;  %v284_v6 = vld [vmem:[%s228_s20] sm:$0xff]  ;;  %v285_v7 = vld [vmem:[%s228_s20 + $0x8] sm:$0xff] }
  0x55   : > { %v293_v1 = vstv %s498_s23  ;;  %s496_s6 = sshll.u32 %s980_s25, 3  ;;  %v286_v8 = vld [vmem:[%s237_s4] sm:$0xff]  ;;  %v287_v9 = vld [vmem:[%s237_s4 + $0x8] sm:$0xff]  ;;  %s501_s24 = sshll.u32 %s797_s17, 7 }
  0x56   : > { %v291_v2 = vshrl.u32 %v290_v0, 7  ;;  %s262_s8 = scalar_lea.vmem [#allocation7], %s496_s6  ;;  %s984_s26 = scalar_lea.vmem [#allocation8], %s496_s6 }
  0x57   : > { %s337_s21 = sshll.u32 %s262_s8, 4  ;;  %s350_s30 = sshll.u32 %s984_s26, 4  ;;  %s992_s21 = int_to_ptr.vmem [resolvable:$true] %s337_s21  ;;  %s999_s30 = int_to_ptr.vmem [resolvable:$true] %s350_s30 }
  0x58   : > { %v292_v3 = vadd.s32 8, %v291_v2  ;;  %v294_v4 = vadd.s32 %v293_v1, %v291_v2  ;;  %s990_s10 = scalar_lea.hbm %s1076_s2, %s501_s24  ;;  %s997_s15 = scalar_lea.hbm %s1077_s3, %s501_s24 }
  0x59   : > { %s319_s20 = scalar_lea.sflag [#allocation4], %s980_s25  ;;  %s666_s5 = scalar_lea.vmem %s992_s21, 128 }
  0x5a   : > { %v295_v5 = vadd.s32 %v293_v1, %v292_v3  ;;  %vm296_vm0 = vcmp.lt.s32.totalorder %v294_v4, 16  ;;  %p667_p2 = scmp.ne.s32.totalorder %s992_s21, %s666_s5  ;;  %p1088_p8 = scmp.ne.s32.totalorder %s1082_s28, 0 }
  0x5b   : > { %v298_v10 = vsel %vm296_vm0, %v284_v6, 0.0  ;;  %v300_v11 = vsel %vm296_vm0, %v286_v8, 0.0  ;;  %s811_s4 = smov [#allocation7]  }
  0x5c   : > { %vm297_vm1 = vcmp.lt.s32.totalorder %v295_v5, 16  ;;  %v302_v14 = vmul.f32 %v300_v11, %v298_v10  ;;  %v305_v15 = vmul.f32 %v298_v10, %v298_v10  ;;  %v307_v18 = vmul.f32 %v300_v11, %v300_v11  ;;  %p668_p9 = pnand %p667_p2, %p1088_p8  ;;  %s670_s23 = sshll.u32 %s811_s4, 4  ;;  %s671_s23 = int_to_ptr.vmem [resolvable:$false] %s670_s23 }
  0x5d   : > { %v299_v12 = vsel %vm297_vm1, %v285_v7, 0.0  ;;  %v301_v13 = vsel %vm297_vm1, %v287_v9, 0.0  ;;  %s672_s6 = scalar_lea.vmem %s671_s23, 256  ;;  %p673_p11 = scmp.lt.s32.totalorder %s992_s21, %s671_s23 }
  0x5e   : > { %v303_v16 = vmul.f32 %v301_v13, %v299_v12  ;;  %v306_v17 = vmul.f32 %v299_v12, %v299_v12  ;;  %v308_v19 = vmul.f32 %v301_v13, %v301_v13  ;;  %v309_v21 = vadd.f32 %v307_v18, %v305_v15  ;;  %p669_p10 = pneg %p668_p9  ;;  %p674_p1 = scmp.lt.s32.totalorder %s672_s6, %s666_s5 }
  0x60   : > { %v304_v20 = vadd.f32 %v303_v16, %v302_v14  ;;  %v310_v22 = vadd.f32 %v308_v19, %v306_v17  ;;  %p675_p3 = por %p674_p1, %p673_p11 }
  0x62   : > { %v311_v23 = vadd.f32 %v310_v22, %v309_v21  ;;  %314 = vst [vmem:[%s262_s8] sm:$0xff] %v304_v20  ;;  %p676_p7 = pnand %p675_p3, %p669_p10 }
  0x64   : > { %679 = shalt.err (!%p676_p7)
}
  0x65   : > { %s680_s24 = scalar_lea.hbm %s990_s10, 128  ;;  %s684_s9 = scalar_lea.hbm %s1076_s2, 256 }
  0x66   : > { %p681_p13 = scmp.ne.s32.totalorder %s990_s10, %s680_s24  ;;  %p685_p12 = scmp.lt.u32.totalorder %s990_s10, %s1076_s2 }
  0x67   : > { %p686_p0 = scmp.lt.u32.totalorder %s684_s9, %s680_s24  ;;  %p688_p2 = scmp.lt.u32.totalorder %s680_s24, %s990_s10 }
  0x68   : > { %p682_p4 = pnand %p681_p13, %p1088_p8 }
  0x69   : > { %p687_p5 = por %p686_p0, %p685_p12 }
  0x6a   : > { %p683_p6 = pneg %p682_p4 }
  0x6b   : > { %p689_p9 = por %p688_p2, %p687_p5 }
  0x6d   : > { %p690_p10 = pnand %p689_p9, %p683_p6 }
  0x6f   : > { %693 = shalt.err (!%p690_p10)
}
  0x70   : > { %511 = dma.vmem_to_hbm [thread:$0]  (%p1088_p8), %s992_s21, 128, %s990_s10, %s319_s20   ;;  %317 = vst [vmem:[%s984_s26] sm:$0xff] %v311_v23 }
  0x71   : > { %s324_s5 = scalar_lea.sflag [#allocation9], %s980_s25  ;;  %s694_s4 = scalar_lea.vmem %s999_s30, 128 }
  0x72   : > { %p695_p11 = scmp.ne.s32.totalorder %s999_s30, %s694_s4  ;;  %s812_s23 = smov [#allocation8]  }
  0x73   : > { %s698_s6 = sshll.u32 %s812_s23, 4  ;;  %s699_s6 = int_to_ptr.vmem [resolvable:$false] %s698_s6 }
  0x74   : > { %p696_p1 = pnand %p695_p11, %p1088_p8  ;;  %s700_s24 = scalar_lea.vmem %s699_s6, 256 }
  0x75   : > { %p701_p7 = scmp.lt.s32.totalorder %s999_s30, %s699_s6  ;;  %p702_p13 = scmp.lt.s32.totalorder %s700_s24, %s694_s4 }
  0x76   : > { %p697_p3 = pneg %p696_p1 }
  0x77   : > { %p703_p4 = por %p702_p13, %p701_p7 }
  0x79   : > { %p704_p6 = pnand %p703_p4, %p697_p3 }
  0x7b   : > { %707 = shalt.err (!%p704_p6)
}
  0x7c   : > { %s708_s25 = scalar_lea.hbm %s997_s15, 128  ;;  %s712_s10 = scalar_lea.hbm %s1077_s3, 256 }
  0x7d   : > { %p709_p12 = scmp.ne.s32.totalorder %s997_s15, %s708_s25  ;;  %p713_p2 = scmp.lt.u32.totalorder %s997_s15, %s1077_s3 }
  0x7e   : > { %p714_p9 = scmp.lt.u32.totalorder %s712_s10, %s708_s25  ;;  %p716_p11 = scmp.lt.u32.totalorder %s708_s25, %s997_s15 }
  0x7f   : > { %p710_p0 = pnand %p709_p12, %p1088_p8 }
  0x80   : > { %p715_p10 = por %p714_p9, %p713_p2 }
  0x81   : > { %p711_p5 = pneg %p710_p0 }
  0x82   : > { %p717_p1 = por %p716_p11, %p715_p10 }
  0x84   : > { %p718_p3 = pnand %p717_p1, %p711_p5 }
  0x86   : > { %721 = shalt.err (!%p718_p3)
}
  0x87   : > { %512 = dma.vmem_to_hbm [thread:$0]  (%p1088_p8), %s999_s30, 128, %s997_s15, %s324_s5  }
  0x88 PF: > { %s362_s7 = sand.u32 1, %s777_s12   ;;  %p1089_p7 = scmp.ne.s32.totalorder %s1083_s29, 0 }
  0x89   : > { %p1090_p13 = scmp.ge.s32.totalorder %s805_s19, 2  ;;  %s363_s9 = scalar_lea.sflag [#allocation4], %s362_s7 }
  0x8b   : > { %p523_p4 = pnand %p1090_p13, %p1089_p7 }
  0x8d   : > { %767 = dma.done.wait (!%p523_p4), %s363_s9, 128  }
  0x8e   : > { %769 = vsyncadd (!%p523_p4), %s363_s9, 4294967168  ;;  %s372_s17 = scalar_lea.sflag [#allocation9], %s362_s7 }
  0x8f   : > { %771 = dma.done.wait (!%p523_p4), %s372_s17, 128  }
  0x90   : > { %773 = vsyncadd (!%p523_p4), %s372_s17, 4294967168  ;;  %s26_s19 = sadd.s32 1, %s805_s19   ;;  %s1091_s12 = smov %s781_s13 }
  0x91   : > { %p23_p6 = scmp.ge.s32.totalorder %s26_s19, 4   ;;  %s1092_s13 = smov %s785_s14 }
  0x92   : > { %s1093_s14 = smov %s891_s27  ;;  %s1094_s15 = smov %s793_s16 }
  0x93   : > { %s1064_s16 = smov 0   ;;  %s1095_s17 = smov %s801_s18 }
  0x94   : > { %s1096_s18 = smov %s1098_s22  ;;  %25 = sbr.rel (!%p23_p6) target bundleno = 11 (0xb), region = 107 }
  0x9b   :  { %377 = vsyncpa [#allocation3], 1 }
  0x9c   :  { %379 = vsyncpa [#allocation3 + $0x1], 1 }
  0x9d   :  { %380 = vsyncpa [#allocation6], 1 }
  0x9e   :  { %382 = vsyncpa [#allocation6 + $0x1], 1 }
  0x9f   :  { %383 = vsyncpa [#allocation4], 1 }
  0xa0   :  { %385 = vsyncpa [#allocation4 + $0x1], 1 }
  0xa1   :  { %386 = vsyncpa [#allocation9], 1 }
  0xa2   :  { %388 = vsyncpa [#allocation9 + $0x1], 1 }

</bundles_post_ra>
